<compile_context>
chip_gen: v7x
topology: tpu7x:2x2x1
jax: 0.10.0
libtpu: 0.0.40
codegen_flags: <defaults>
</compile_context>

<pallas_src>
import functools

import jax
import jax.numpy as jnp
from jax.experimental import pallas as pl
from jax.experimental.pallas import tpu as pltpu


def _channel_attention_kernel(x_ref, y_ref, w1_ref, b1_ref, w2_ref, b2_ref,
                              sig_ref, att_ref, acc_ref, *,
                              inv_l, true_l, mask_l):
    l = pl.program_id(1)
    tb = acc_ref.shape[0] // 2          # rows [:tb] = running sum, [tb:] = running max
    tl = x_ref.shape[2]

    @pl.when(l == 0)
    def _init():
        row = jax.lax.broadcasted_iota(jnp.int32, (2 * tb, 1), 0)
        acc_ref[...] = jnp.where(row < tb,
                                 jnp.zeros_like(acc_ref),
                                 jnp.full_like(acc_ref, -jnp.inf))

    # Fused single pass over the tile: partial sum + partial max from the same
    # loaded vregs.  The sum accumulates in f32 even for bf16 inputs.
    x = x_ref[...]                                                    # (tb, C, tl)
    if mask_l:
        # Ragged L: mask columns past the true length (sum gets 0, max gets -inf).
        col = l * tl + jax.lax.broadcasted_iota(jnp.int32, (1, 1, tl), 2)
        valid = col < true_l
        xf = x.astype(jnp.float32)
        part_sum = jnp.sum(jnp.where(valid, xf, 0.0), axis=-1)
        part_max = jnp.max(jnp.where(valid, xf, -jnp.inf), axis=-1)
    else:
        part_sum = jnp.sum(x, axis=-1, dtype=jnp.float32)
        part_max = jnp.max(x, axis=-1).astype(jnp.float32)

    acc_ref[pl.ds(0, tb), :] += part_sum
    acc_ref[pl.ds(tb, tb), :] = jnp.maximum(acc_ref[pl.ds(tb, tb), :], part_max)

    @pl.when(l == pl.num_programs(1) - 1)
    def _finalize():
        # Scale only the sum rows by 1/L; the max rows pass through unchanged.
        row = jax.lax.broadcasted_iota(jnp.int32, (2 * tb, 1), 0)
        v = acc_ref[...] * jnp.where(row < tb, inv_l, 1.0)            # (2*tb, C)

        w1 = w1_ref[...].astype(jnp.float32)
        b1 = b1_ref[...].astype(jnp.float32)
        w2 = w2_ref[...].astype(jnp.float32)
        b2 = b2_ref[...].astype(jnp.float32)
        y = y_ref[...].astype(jnp.float32)

        # Batch avg & max through the 2-layer MLP in one shot (2 matmuls, not 4).
        h = jnp.maximum(jnp.dot(v, w1, preferred_element_type=jnp.float32) + b1,
                        0.0)                                          # ReLU
        o = jnp.dot(h, w2, preferred_element_type=jnp.float32) + b2   # (2*tb, C)

        out = (o[:tb] + o[tb:]) * y                                   # (tb, C)
        sig_ref[...] = jax.nn.sigmoid(out).astype(sig_ref.dtype)
        att_ref[...] = (out * 0.5 + y * 2.0).astype(att_ref.dtype)


def _round_down(n, align):
    return (n // align) * align


def channel_attention(x, y, w1, b1, w2, b2, *, block_budget_bytes=8 * 1024 * 1024):
    B, C, L = x.shape
    itemsize = x.dtype.itemsize

    # ---- tiling --------------------------------------------------------------
    # Base batch tile: 8 rows (sublane alignment for the (tb, C) outputs/scratch),
    # or the whole batch if it is smaller than a sublane tile.
    tb = B if B < 8 else 8

    # Lane (L) tile: as large as the x-block budget allows, a multiple of 128 (or
    # all of L).  tb stays at 8, so big C never blows the budget through tb.
    tl_budget = max(128, _round_down(block_budget_bytes // max(1, tb * C * itemsize),
                                     128))
    if L <= tl_budget:
        tl = L
        # Whole L fits in one grid step -> spend leftover budget on more batch
        # rows per step (amortizes ~0.35us/step grid overhead for large B).
        if B > tb:
            max_tb = _round_down(block_budget_bytes // max(1, C * tl * itemsize), 8)
            # Keep the (tb, C) f32 blocks (y, outputs, accumulator) modest too.
            max_tb = min(max_tb,
                         max(8, _round_down((2 * 1024 * 1024) // max(1, C * 4), 8)))
            tb = max(tb, min(max_tb, max(8, _round_down(B, 8))))
    else:
        tl = tl_budget

    # v7x megacore: keep >= 2 tiles on the parallel B axis when the batch allows.
    if B >= 16 and pl.cdiv(B, tb) < 2:
        tb = max(8, _round_down(tb // 2, 8))

    grid = (pl.cdiv(B, tb), pl.cdiv(L, tl))
    mask_l = (L % tl) != 0

    kernel = functools.partial(_channel_attention_kernel,
                               inv_l=1.0 / L, true_l=L, mask_l=mask_l)

    sig, att = pl.pallas_call(
        kernel,
        out_shape=(
            jax.ShapeDtypeStruct((B, C), jnp.float32),   # sigmoid(out)
            jax.ShapeDtypeStruct((B, C), jnp.float32),   # att_weight
        ),
        grid_spec=pltpu.PrefetchScalarGridSpec(
            num_scalar_prefetch=0,
            grid=grid,
            in_specs=[
                pl.BlockSpec((tb, C, tl), lambda b, l: (b, 0, l)),   # x
                pl.BlockSpec((tb, C), lambda b, l: (b, 0)),          # y
                pl.BlockSpec(w1.shape, lambda b, l: (0, 0)),         # w1 (C, H)
                pl.BlockSpec(b1.shape, lambda b, l: (0, 0)),         # b1 (1, H)
                pl.BlockSpec(w2.shape, lambda b, l: (0, 0)),         # w2 (H, C)
                pl.BlockSpec(b2.shape, lambda b, l: (0, 0)),         # b2 (1, C)
            ],
            out_specs=(
                pl.BlockSpec((tb, C), lambda b, l: (b, 0)),
                pl.BlockSpec((tb, C), lambda b, l: (b, 0)),
            ),
            scratch_shapes=[
                # Single accumulator: rows [:tb] running sum, rows [tb:] running max.
                pltpu.VMEM((2 * tb, C), jnp.float32),
            ],
        ),
        compiler_params=pltpu.CompilerParams(
            dimension_semantics=("parallel", "arbitrary"),
            # Explicit limit: legalizes 8 MiB double-buffered x blocks on v5e/v6e
            # (scoped defaults 16/32 MiB) and stays under v7x's 64 MiB physical VMEM.
            vmem_limit_bytes=48 * 1024 * 1024,
        ),
    )(x, y, w1, b1, w2, b2)

    # .unsqueeze(dim=2) from the PyTorch module — pure reshape glue.
    return sig[:, :, None], att


def _reference(x, y, w1, b1, w2, b2):
    avg = jnp.mean(x, axis=-1)
    mx = jnp.max(x, axis=-1)

    def fc(v):
        return jnp.maximum(v @ w1 + b1, 0.0) @ w2 + b2

    out = (fc(avg) + fc(mx)) * y
    return jax.nn.sigmoid(out)[:, :, None], out / 2.0 + y * 2.0


def _make_inputs(key, B, C, L):
    H = C // 2
    kx, ky, kw1, kb1, kw2, kb2 = jax.random.split(key, 6)
    x = jax.random.normal(kx, (B, C, L), dtype=jnp.float32)
    y = jax.random.normal(ky, (B, C), dtype=jnp.float32)
    bound1 = 1.0 / (C ** 0.5)
    bound2 = 1.0 / (H ** 0.5)
    w1 = jax.random.uniform(kw1, (C, H), jnp.float32, -bound1, bound1)
    b1 = jax.random.uniform(kb1, (1, H), jnp.float32, -bound1, bound1)
    w2 = jax.random.uniform(kw2, (H, C), jnp.float32, -bound2, bound2)
    b2 = jax.random.uniform(kb2, (1, C), jnp.float32, -bound2, bound2)
    return x, y, w1, b1, w2, b2


def _check(args, **kw):
    sig, att = channel_attention(*args, **kw)
    jax.block_until_ready((sig, att))
    sig_ref, att_ref = _reference(*args)
    B, C, _ = args[0].shape
    assert sig.shape == (B, C, 1) and att.shape == (B, C)
    assert jnp.allclose(sig, sig_ref, atol=1e-5, rtol=1e-5)
    assert jnp.allclose(att, att_ref, atol=1e-5, rtol=1e-5)


if __name__ == "__main__":
    key = jax.random.PRNGKey(0)
    k1, k2 = jax.random.split(key)

    # Small canonical config (in_planes = C = 8, hidden = C // 2 = 4).
    _check(_make_inputs(k1, B=2, C=8, L=16))

    # Multi-tile config with ragged B and ragged L (tiny block budget forces the
    # L-masked, multi-step reduction + multiple parallel B tiles).
    _check(_make_inputs(k2, B=10, C=16, L=1000), block_budget_bytes=64 * 1024)

    print("KERNEL_OK")
</pallas_src>

<mosaic_0001>
module attributes {stable_mosaic.version = 11 : i64} {
  func.func @_channel_attention_kernel(%arg0: i32, %arg1: i32, %arg2: memref<2x8x16xf32, #tpu.memory_space<vmem>>, %arg3: memref<2x8xf32, #tpu.memory_space<vmem>>, %arg4: memref<8x4xf32, #tpu.memory_space<vmem>>, %arg5: memref<1x4xf32, #tpu.memory_space<vmem>>, %arg6: memref<4x8xf32, #tpu.memory_space<vmem>>, %arg7: memref<1x8xf32, #tpu.memory_space<vmem>>, %arg8: memref<2x8xf32, #tpu.memory_space<vmem>>, %arg9: memref<2x8xf32, #tpu.memory_space<vmem>>, %arg10: memref<4x8xf32, #tpu.memory_space<vmem>>) attributes {dimension_semantics = [#tpu.dimension_semantics<parallel>, #tpu.dimension_semantics<arbitrary>], iteration_bounds = array<i64: 1, 1>, scalar_prefetch = 0 : i64, scratch_operands = 1 : i64, tpu.core_type = #tpu.core_type<tc>, window_params = [{transform_indices = @transform_0, window_bounds = array<i64: 2, 8, 16>}, {transform_indices = @transform_1, window_bounds = array<i64: 2, 8>}, {pipeline_mode = #tpu.pipeline_mode<synchronous>, transform_indices = @transform_2, window_bounds = array<i64: 8, 4>}, {pipeline_mode = #tpu.pipeline_mode<synchronous>, transform_indices = @transform_3, window_bounds = array<i64: 1, 4>}, {pipeline_mode = #tpu.pipeline_mode<synchronous>, transform_indices = @transform_4, window_bounds = array<i64: 4, 8>}, {pipeline_mode = #tpu.pipeline_mode<synchronous>, transform_indices = @transform_5, window_bounds = array<i64: 1, 8>}, {transform_indices = @transform_6, window_bounds = array<i64: 2, 8>}, {transform_indices = @transform_7, window_bounds = array<i64: 2, 8>}]} {
    %c0_i32 = arith.constant 0 : i32
    %0 = arith.cmpi eq, %arg1, %c0_i32 : i32
    %1 = arith.extui %0 : i1 to i32
    %c0_i32_0 = arith.constant 0 : i32
    %2 = arith.cmpi ne, %1, %c0_i32_0 : i32
    scf.if %2 {
      %15 = tpu.iota {dimensions = array<i32: 0>} : vector<4x1xi32>
      %c2_i32 = arith.constant 2 : i32
      %16 = vector.broadcast %c2_i32 : i32 to vector<4x1xi32>
      %17 = arith.cmpi slt, %15, %16 : vector<4x1xi32>
      %cst_13 = arith.constant 0.000000e+00 : f32
      %18 = vector.broadcast %cst_13 : f32 to vector<4x8xf32>
      %cst_14 = arith.constant 0xFF800000 : f32
      %19 = vector.broadcast %cst_14 : f32 to vector<4x8xf32>
      %20 = vector.shape_cast %17 : vector<4x1xi1> to vector<4x1xi1>
      %21 = vector.broadcast %20 : vector<4x1xi1> to vector<4x8xi1>
      %22 = arith.select %21, %18, %19 : vector<4x8xi1>, vector<4x8xf32>
      %c0_15 = arith.constant 0 : index
      %c0_16 = arith.constant 0 : index
      %23 = vector.load %arg10[%c0_15, %c0_16] : memref<4x8xf32, #tpu.memory_space<vmem>>, vector<4x8xf32>
      tpu.vector_store %arg10[%c0_15, %c0_16], %22 {strides = array<i32>} : memref<4x8xf32, #tpu.memory_space<vmem>>, vector<4x8xf32>,
    } else {
    }
    %c0 = arith.constant 0 : index
    %c0_1 = arith.constant 0 : index
    %c0_2 = arith.constant 0 : index
    %3 = vector.load %arg2[%c0, %c0_1, %c0_2] : memref<2x8x16xf32, #tpu.memory_space<vmem>>, vector<2x8x16xf32>
    %cst = arith.constant dense<0.000000e+00> : vector<2x8xf32>
    %4 = vector.multi_reduction <add>, %3, %cst [2] : vector<2x8x16xf32> to vector<2x8xf32>
    %cst_3 = arith.constant dense<0xFF800000> : vector<2x8xf32>
    %5 = vector.multi_reduction <maximumf>, %3, %cst_3 [2] : vector<2x8x16xf32> to vector<2x8xf32>
    %c0_4 = arith.constant 0 : index
    %c0_5 = arith.constant 0 : index
    %6 = vector.load %arg10[%c0_4, %c0_5] : memref<4x8xf32, #tpu.memory_space<vmem>>, vector<2x8xf32>
    %7 = arith.addf %6, %4 : vector<2x8xf32>
    %c0_6 = arith.constant 0 : index
    %c0_7 = arith.constant 0 : index
    %8 = vector.load %arg10[%c0_6, %c0_7] : memref<4x8xf32, #tpu.memory_space<vmem>>, vector<2x8xf32>
    tpu.vector_store %arg10[%c0_6, %c0_7], %7 {strides = array<i32>} : memref<4x8xf32, #tpu.memory_space<vmem>>, vector<2x8xf32>,
    %c2 = arith.constant 2 : index
    %c0_8 = arith.constant 0 : index
    %9 = vector.load %arg10[%c2, %c0_8] : memref<4x8xf32, #tpu.memory_space<vmem>>, vector<2x8xf32>
    %10 = arith.maximumf %9, %5 : vector<2x8xf32>
    %c2_9 = arith.constant 2 : index
    %c0_10 = arith.constant 0 : index
    %11 = vector.load %arg10[%c2_9, %c0_10] : memref<4x8xf32, #tpu.memory_space<vmem>>, vector<2x8xf32>
    tpu.vector_store %arg10[%c2_9, %c0_10], %10 {strides = array<i32>} : memref<4x8xf32, #tpu.memory_space<vmem>>, vector<2x8xf32>,
    %c0_i32_11 = arith.constant 0 : i32
    %12 = arith.cmpi eq, %arg1, %c0_i32_11 : i32
    %13 = arith.extui %12 : i1 to i32
    %c0_i32_12 = arith.constant 0 : i32
    %14 = arith.cmpi ne, %13, %c0_i32_12 : i32
    scf.if %14 {
      %15 = tpu.iota {dimensions = array<i32: 0>} : vector<4x1xi32>
      %c0_13 = arith.constant 0 : index
      %c0_14 = arith.constant 0 : index
      %16 = vector.load %arg10[%c0_13, %c0_14] : memref<4x8xf32, #tpu.memory_space<vmem>>, vector<4x8xf32>
      %c2_i32 = arith.constant 2 : i32
      %17 = vector.broadcast %c2_i32 : i32 to vector<4x1xi32>
      %18 = arith.cmpi slt, %15, %17 : vector<4x1xi32>
      %cst_15 = arith.constant 6.250000e-02 : f32
      %cst_16 = arith.constant 1.000000e+00 : f32
      %19 = vector.broadcast %cst_15 : f32 to vector<4x1xf32>
      %20 = vector.broadcast %cst_16 : f32 to vector<4x1xf32>
      %21 = arith.select %18, %19, %20 : vector<4x1xi1>, vector<4x1xf32>
      %22 = vector.broadcast %21 : vector<4x1xf32> to vector<4x8xf32>
      %23 = arith.mulf %16, %22 : vector<4x8xf32>
      %c0_17 = arith.constant 0 : index
      %c0_18 = arith.constant 0 : index
      %24 = vector.load %arg4[%c0_17, %c0_18] : memref<8x4xf32, #tpu.memory_space<vmem>>, vector<8x4xf32>
      %c0_19 = arith.constant 0 : index
      %c0_20 = arith.constant 0 : index
      %25 = vector.load %arg5[%c0_19, %c0_20] : memref<1x4xf32, #tpu.memory_space<vmem>>, vector<1x4xf32>
      %c0_21 = arith.constant 0 : index
      %c0_22 = arith.constant 0 : index
      %26 = vector.load %arg6[%c0_21, %c0_22] : memref<4x8xf32, #tpu.memory_space<vmem>>, vector<4x8xf32>
      %c0_23 = arith.constant 0 : index
      %c0_24 = arith.constant 0 : index
      %27 = vector.load %arg7[%c0_23, %c0_24] : memref<1x8xf32, #tpu.memory_space<vmem>>, vector<1x8xf32>
      %c0_25 = arith.constant 0 : index
      %c0_26 = arith.constant 0 : index
      %28 = vector.load %arg3[%c0_25, %c0_26] : memref<2x8xf32, #tpu.memory_space<vmem>>, vector<2x8xf32>
      %cst_27 = arith.constant dense<0.000000e+00> : vector<4x4xf32>
      %29 = tpu.matmul %23, %24, %cst_27 {dimension_numbers = #tpu.dot_dimension_numbers<[1], [0], [0], [1], [0, 0, 1, 1], [], []>} : vector<4x8xf32>, vector<8x4xf32>, vector<4x4xf32> -> vector<4x4xf32>
      %30 = vector.broadcast %25 : vector<1x4xf32> to vector<4x4xf32>
      %31 = arith.addf %29, %30 : vector<4x4xf32>
      %cst_28 = arith.constant 0.000000e+00 : f32
      %32 = vector.broadcast %cst_28 : f32 to vector<4x4xf32>
      %33 = arith.maximumf %31, %32 : vector<4x4xf32>
      %cst_29 = arith.constant dense<0.000000e+00> : vector<4x8xf32>
      %34 = tpu.matmul %33, %26, %cst_29 {dimension_numbers = #tpu.dot_dimension_numbers<[1], [0], [0], [1], [0, 0, 1, 1], [], []>} : vector<4x4xf32>, vector<4x8xf32>, vector<4x8xf32> -> vector<4x8xf32>
      %35 = vector.broadcast %27 : vector<1x8xf32> to vector<4x8xf32>
      %36 = arith.addf %34, %35 : vector<4x8xf32>
      %37 = vector.extract_strided_slice %36 {offsets = [0, 0], sizes = [2, 8], strides = [1, 1]} : vector<4x8xf32> to vector<2x8xf32>
      %38 = vector.extract_strided_slice %36 {offsets = [2, 0], sizes = [2, 8], strides = [1, 1]} : vector<4x8xf32> to vector<2x8xf32>
      %39 = arith.addf %37, %38 : vector<2x8xf32>
      %40 = arith.mulf %39, %28 : vector<2x8xf32>
      %41 = arith.negf %40 : vector<2x8xf32>
      %42 = math.exp %41 : vector<2x8xf32>
      %cst_30 = arith.constant 1.000000e+00 : f32
      %43 = vector.broadcast %cst_30 : f32 to vector<2x8xf32>
      %44 = arith.addf %43, %42 : vector<2x8xf32>
      %45 = arith.divf %43, %44 : vector<2x8xf32>
      %c0_31 = arith.constant 0 : index
      %c0_32 = arith.constant 0 : index
      %46 = vector.load %arg8[%c0_31, %c0_32] : memref<2x8xf32, #tpu.memory_space<vmem>>, vector<2x8xf32>
      tpu.vector_store %arg8[%c0_31, %c0_32], %45 {strides = array<i32>} : memref<2x8xf32, #tpu.memory_space<vmem>>, vector<2x8xf32>,
      %cst_33 = arith.constant 5.000000e-01 : f32
      %47 = vector.broadcast %cst_33 : f32 to vector<2x8xf32>
      %48 = arith.mulf %40, %47 : vector<2x8xf32>
      %cst_34 = arith.constant 2.000000e+00 : f32
      %49 = vector.broadcast %cst_34 : f32 to vector<2x8xf32>
      %50 = arith.mulf %28, %49 : vector<2x8xf32>
      %51 = arith.addf %48, %50 : vector<2x8xf32>
      %c0_35 = arith.constant 0 : index
      %c0_36 = arith.constant 0 : index
      %52 = vector.load %arg9[%c0_35, %c0_36] : memref<2x8xf32, #tpu.memory_space<vmem>>, vector<2x8xf32>
      tpu.vector_store %arg9[%c0_35, %c0_36], %51 {strides = array<i32>} : memref<2x8xf32, #tpu.memory_space<vmem>>, vector<2x8xf32>,
    } else {
    }
    return
  }
  func.func @transform_0(%arg0: i32, %arg1: i32) -> (i32, i32, i32) {
    %c0_i32 = arith.constant 0 : i32
    %c0_i32_0 = arith.constant 0 : i32
    return %arg0, %c0_i32, %arg1 : i32, i32, i32
  }
  func.func @transform_1(%arg0: i32, %arg1: i32) -> (i32, i32) {
    %c0_i32 = arith.constant 0 : i32
    %c0_i32_0 = arith.constant 0 : i32
    return %arg0, %c0_i32 : i32, i32
  }
  func.func @transform_2(%arg0: i32, %arg1: i32) -> (i32, i32) {
    %c0_i32 = arith.constant 0 : i32
    %c0_i32_0 = arith.constant 0 : i32
    %c0_i32_1 = arith.constant 0 : i32
    return %c0_i32, %c0_i32_0 : i32, i32
  }
  func.func @transform_3(%arg0: i32, %arg1: i32) -> (i32, i32) {
    %c0_i32 = arith.constant 0 : i32
    %c0_i32_0 = arith.constant 0 : i32
    %c0_i32_1 = arith.constant 0 : i32
    return %c0_i32, %c0_i32_0 : i32, i32
  }
  func.func @transform_4(%arg0: i32, %arg1: i32) -> (i32, i32) {
    %c0_i32 = arith.constant 0 : i32
    %c0_i32_0 = arith.constant 0 : i32
    %c0_i32_1 = arith.constant 0 : i32
    return %c0_i32, %c0_i32_0 : i32, i32
  }
  func.func @transform_5(%arg0: i32, %arg1: i32) -> (i32, i32) {
    %c0_i32 = arith.constant 0 : i32
    %c0_i32_0 = arith.constant 0 : i32
    %c0_i32_1 = arith.constant 0 : i32
    return %c0_i32, %c0_i32_0 : i32, i32
  }
  func.func @transform_6(%arg0: i32, %arg1: i32) -> (i32, i32) {
    %c0_i32 = arith.constant 0 : i32
    %c0_i32_0 = arith.constant 0 : i32
    return %arg0, %c0_i32 : i32, i32
  }
  func.func @transform_7(%arg0: i32, %arg1: i32) -> (i32, i32) {
    %c0_i32 = arith.constant 0 : i32
    %c0_i32_0 = arith.constant 0 : i32
    return %arg0, %c0_i32 : i32, i32
  }
}

</mosaic_0001>

<bundles_post_ra>
// kernel: tpu_custom_call.1
= control target key start
LH: loop header
LB: loop body
LE: loop exit
PB: predicated region body
PF: predicated region fallthrough
CT: control target
= control target key end

     0   :  { %13 = vsyncpa [#allocation4], 0  ;;  %s537_s0 = inlined_call_operand.hbm [shape: f32[2,8,16], index: 0, kind: input, shape index: {}]   ;;  %s538_s1 = inlined_call_operand.vmem [shape: f32[2,8], index: 1, kind: input, shape index: {}]   ;;  %s539_s2 = inlined_call_operand.vmem [shape: f32[8,4], index: 2, kind: input, shape index: {}]   ;;  %s540_s3 = inlined_call_operand.vmem [shape: f32[1,4], index: 3, kind: input, shape index: {}]   ;;  %s541_s4 = inlined_call_operand.vmem [shape: f32[4,8], index: 4, kind: input, shape index: {}]   ;;  %s542_s5 = inlined_call_operand.vmem [shape: f32[1,8], index: 5, kind: input, shape index: {}]   ;;  %s543_s6 = inlined_call_operand.hbm [shape: f32[2,8], index: 6, kind: output, shape index: {0}]   ;;  %s544_s7 = inlined_call_operand.hbm [shape: f32[2,8], index: 7, kind: output, shape index: {1}]  }
   0x1   :  { %14 = vsyncpa [#allocation5], 0 }
   0x2   :  { %15 = vsyncpa [#allocation8], 0  ;;  %s431_s24 = smov [#allocation3]   ;;  %s359_s28 = scalar_lea.hbm %s537_s0, 256 }
   0x3   :  { %s21_s25 = sshll.u32 %s431_s24, 4  ;;  %p360_p0 = scmp.ne.s32.totalorder %s537_s0, %s359_s28  ;;  %s22_s25 = int_to_ptr.vmem [resolvable:$true] %s21_s25 }
   0x4   :  { %p363_p1 = scmp.lt.u32.totalorder %s359_s28, %s537_s0 }
   0x6   :  { %p365_p2 = pnand %p363_p1, %p360_p0 }
   0x8   :  { %368 = shalt.err (!%p365_p2)
}
   0x9   :  { %s369_s10 = scalar_lea.vmem %s22_s25, 256  ;;  %p374_p4 = scmp.lt.s32.totalorder %s22_s25, %s22_s25 }
   0xa   :  { %p370_p3 = scmp.ne.s32.totalorder %s22_s25, %s369_s10  ;;  %p375_p5 = scmp.lt.s32.totalorder %s369_s10, %s369_s10 }
   0xc   :  { %p376_p6 = por %p375_p5, %p374_p4 }
   0xe   :  { %p377_p7 = pnand %p376_p6, %p370_p3 }
  0x10   :  { %380 = shalt.err (!%p377_p7)
}
  0x11   :  { %s432_s11 = smov 128   ;;  %s433_s12 = smov 8  }
  0x12   :  { %27 = dma.hbm_to_vmem [thread:$0]  %s537_s0, 256, %s22_s25, [#allocation4], %s432_s11, %s432_s11, %s433_s12  }
  0x13   :  { %425 = dma.done.wait [#allocation4], 256  }
  0x14   :  { %426 = vsyncadd [#allocation4], 4294967040  ;;  %v45_v0 = vlaneseq  ;;  %vm55_vm0 = vcmask 130048   ;;  %v53_v4 = vld [vmem:[#allocation3] sm:$0xff]  ;;  %v54_v5 = vld [vmem:[#allocation3 + $0x8] sm:$0xff]  ;;  %v434_v10 = vmov -inf  }
  0x15   :  { %v62_v6 = vsel %vm55_vm0, %v53_v4, -inf  ;;  %v56_v7 = vsel %vm55_vm0, %v53_v4, 0.0  ;;  %v65_v8 = vsel %vm55_vm0, %v54_v5, -inf  ;;  %v59_v9 = vsel %vm55_vm0, %v54_v5, 0.0  ;;  %v111_v12 = vld [vmem:[%s539_s2] sm:$0xff] }
  0x16   :  { %v46_v1 = vshrl.u32 %v45_v0, 7  ;;  %v72_v2 = vand.u32 127, %v45_v0  ;;  %63 = vmax.xlane.f32.xlu1 %v62_v6  ;;  %57 = vadd.xlane.f32.xlu0 %v56_v7  ;;  %vm51_vm2 = vcmask 60416   ;;  %v435_v13 = vmov 0.0   ;;  %v113_v32 = vld [vmem:[%s541_s4] sm:$0xf] }
  0x17   :  { %336 = vmatprep.subr.mxu0 %v435_v13  ;;  %vm436_vm3 = vmmov 0   ;;  %341 = vmatprep.subr.mxu1 %v435_v13  ;;  %vm81_vm4 = vcmask 1041409   ;;  %vm85_vm5 = vcmask 58368   ;;  %v437_v28 = vmov 1.0   ;;  %v326_v33 = vld [vmem:[%s540_s3] ss:$0 sm:$0xff] }
  0x18   :  { %v75_v3 = vsub.s32 %v72_v2, %v46_v1  ;;  %vm47_vm1 = vcmp.lt.s32.totalorder %v46_v1, 2  ;;  %338 = vmatprep.mubr.msk.f32.mxu0 %vm436_vm3, %v435_v13  ;;  %337 = vmatpush3.msra.mxu0 %v111_v12  ;;  %vm122_vm6 = vcmask 64512   ;;  %vm207_vm7 = vcmask 1043456   ;;  %v328_v38 = vld [vmem:[%s542_s5] ss:$0 sm:$0xff]  ;;  %s438_s3 = smov [#allocation7]  }
  0x19   :  { %v50_v11 = vsel %vm47_vm1, 0.0, %v434_v10  ;;  %343 = vmatprep.mubr.msk.f32.mxu1 %vm436_vm3, %v435_v13  ;;  %v109_v29 = vsel %vm47_vm1, 0.0625, %v437_v28  ;;  %342 = vmatpush3.msk.msra.mxu1 %vm207_vm7, %v113_v32  ;;  %vm203_vm8 = vcmask 31744   ;;  %v115_v43 = vld [vmem:[%s538_s1] sm:$0x3]  ;;  %s313_s22 = sshll.u32 %s438_s3, 4  ;;  %s314_s22 = int_to_ptr.vmem [resolvable:$true] %s313_s22 }
  0x1a   :  { %66 = vmax.xlane.f32.xlu1 %v65_v8  ;;  %60 = vadd.xlane.f32.xlu0 %v59_v9  ;;  %52 = vst.msk [vmem:[#allocation2] sm:$0xf] %vm51_vm2, %v50_v11  ;;  %v294_v46 = vmul.f32 2.0, %v115_v43  ;;  %s381_s5 = scalar_lea.vmem %s314_s22, 32  ;;  %p386_p9 = scmp.lt.s32.totalorder %s314_s22, %s314_s22 }
  0x1b   :  { %p382_p8 = scmp.ne.s32.totalorder %s314_s22, %s381_s5  ;;  %p387_p10 = scmp.lt.s32.totalorder %s381_s5, %s381_s5 }
  0x1d   :  { %p388_p11 = por %p387_p10, %p386_p9 }
  0x1f   :  { %p389_p12 = pnand %p388_p11, %p382_p8 }
  0x21   :  { %v87_v20 = vld [vmem:[#allocation2 + $0x2] sm:$0x3]  ;;  %v68_v22 = vld [vmem:[#allocation2] sm:$0x3] }
  0xa3   :  { %v64_v14 = vpop.xlane.xlu1 %63  ;;  %v58_v15 = vpop.xlane.xlu0 %57 }
  0xa4   :  { %v93_v18 = vrot.slane %v64_v14, %v75_v3  ;;  %v76_v19 = vrot.slane %v58_v15, %v75_v3 }
  0xa7   :  { %v67_v16 = vpop.xlane.xlu1 %66  ;;  %v61_v17 = vpop.xlane.xlu0 %60 }
  0xa8   :  { %v97_v21 = vrot.slane %v67_v16, %v75_v3  ;;  %v80_v23 = vrot.slane %v61_v17, %v75_v3 }
  0xaa   :  { %v98_v24 = vsel %vm81_vm4, %v97_v21, %v93_v18  ;;  %v82_v25 = vsel %vm81_vm4, %v80_v23, %v76_v19 }
  0xab   :  { %v100_v26 = vmax.f32 %v87_v20, %v98_v24  ;;  %v84_v27 = vadd.f32 %v82_v25, %v68_v22 }
  0xad   :  { %101 = vst.msk [vmem:[#allocation2 + $0x2] sm:$0x3] %vm85_vm5, %v100_v26  ;;  %86 = vst.msk [vmem:[#allocation2] sm:$0x3] %vm85_vm5, %v84_v27 }
  0xb4   :  { %v107_v30 = vld [vmem:[#allocation2] sm:$0xf] }
  0xb5   :  { %v110_v31 = vmul.f32 %v109_v29, %v107_v30 }
  0xb7   :  { %339 = vmatmul.mubr.msk.f32.vlgmr.msra.gmra.mrb[0].mxu0 %vm122_vm6, %v110_v31 }
 0x18a   :  { %v192_v34 = vpop.f32.mrb[0].mxu0 }
 0x18b   :  { %v193_v35 = vadd.f32 %v326_v33, %v192_v34  ;;  %v340_v36 = vpop.f32.mrb[1].mxu0 }
 0x18d   :  { %v196_v37 = vmax.f32 %v193_v35, 0.0 }
 0x18f   :  { %344 = vmatmul.mubr.msk.f32.vlgmr.msra.gmra.mrb[0].mxu1 %vm203_vm8, %v196_v37 }
 0x262   :  { %v277_v39 = vpop.f32.mrb[0].mxu1 }
 0x263   :  { %v278_v40 = vadd.f32 %v328_v38, %v277_v39  ;;  %v345_v41 = vpop.f32.mrb[1].mxu1 }
 0x265   :  { %v282_v42 = vrot.slane %v278_v40, 2 }
 0x267   :  { %v284_v44 = vadd.f32 %v282_v42, %v278_v40 }
 0x269   :  { %v285_v45 = vmul.f32 %v284_v44, %v115_v43 }
 0x26b   :  { %v331_v47 = vmul.f32 -1.442695, %v285_v45  ;;  %v293_v48 = vmul.f32 0.5, %v285_v45 }
 0x26d   :  { %355 = vpow2.f32 %v331_v47  ;;  %v295_v49 = vadd.f32 %v294_v46, %v293_v48 }
 0x26f   :  { %296 = vst.msk [vmem:[#allocation7] sm:$0x3] %vm85_vm5, %v295_v49 }
 0x270   :  { %392 = shalt.err (!%p389_p12)
}
 0x271   :  { %s393_s24 = scalar_lea.hbm %s544_s7, 32 }
 0x272   :  { %p394_p13 = scmp.ne.s32.totalorder %s544_s7, %s393_s24  ;;  %p397_p0 = scmp.lt.u32.totalorder %s393_s24, %s544_s7 }
 0x274   :  { %p399_p1 = pnand %p397_p0, %p394_p13 }
 0x276   :  { %402 = shalt.err (!%p399_p1)
}
 0x277   :  { %316 = dma.vmem_to_hbm [thread:$0]  %s314_s22, 32, %s544_s7, [#allocation8]   ;;  %v356_v50 = vpop.eup %355 }
 0x278   :  { %v289_v51 = vadd.f32 1.0, %v356_v50  ;;  %s439_s8 = smov [#allocation6]  }
 0x279   :  { %s303_s9 = sshll.u32 %s439_s8, 4  ;;  %s304_s9 = int_to_ptr.vmem [resolvable:$true] %s303_s9 }
 0x27a   :  { %357 = vrcp.f32 %v289_v51  ;;  %s403_s10 = scalar_lea.vmem %s304_s9, 32  ;;  %p408_p3 = scmp.lt.s32.totalorder %s304_s9, %s304_s9 }
 0x27b   :  { %p404_p2 = scmp.ne.s32.totalorder %s304_s9, %s403_s10  ;;  %p409_p4 = scmp.lt.s32.totalorder %s403_s10, %s403_s10 }
 0x27d   :  { %p410_p5 = por %p409_p4, %p408_p3 }
 0x27f   :  { %p411_p6 = pnand %p410_p5, %p404_p2 }
 0x284   :  { %v358_v52 = vpop.eup %357 }
 0x285   :  { %292 = vst.msk [vmem:[#allocation6] sm:$0x3] %vm85_vm5, %v358_v52 }
 0x286   :  { %414 = shalt.err (!%p411_p6)
}
 0x287   :  { %s415_s7 = scalar_lea.hbm %s543_s6, 32 }
 0x288   :  { %p416_p7 = scmp.ne.s32.totalorder %s543_s6, %s415_s7  ;;  %p419_p8 = scmp.lt.u32.totalorder %s415_s7, %s543_s6 }
 0x28a   :  { %p421_p9 = pnand %p419_p8, %p416_p7 }
 0x28c   :  { %424 = shalt.err (!%p421_p9)
}
 0x28d   :  { %306 = dma.vmem_to_hbm [thread:$0]  %s304_s9, 32, %s543_s6, [#allocation5]  }
 0x28e   :  { %427 = dma.done.wait [#allocation5], 32  }
 0x28f   :  { %428 = vsyncadd [#allocation5], 4294967264 }
 0x290   :  { %429 = dma.done.wait [#allocation8], 32  }
 0x291   :  { %430 = vsyncadd [#allocation8], 4294967264 }
 0x292   :  { %323 = vsyncpa [#allocation4], 1 }
 0x293   :  { %324 = vsyncpa [#allocation5], 1 }
 0x294   :  { %325 = vsyncpa [#allocation8], 1 }

</bundles_post_ra>
